<compile_context>
chip_gen: v6e
topology: v6e:2x2x1
jax: 0.10.0
libtpu: 0.0.40
codegen_flags: <defaults>
</compile_context>

<pallas_src>
import functools
import math

import jax
import jax.numpy as jnp
from jax.experimental import pallas as pl
from jax.experimental.pallas import tpu as pltpu

BN_EPS = 1e-5


# ---------------------------------------------------------------------------
# In-kernel building blocks (operate on loaded values, (N, B*F) folded layout)
# ---------------------------------------------------------------------------
def _gc_layer(y_bf, w_bf, att_bf, bias_f32, *, batch, fin, fout):
    """One GraphConvolution:  att @ (y @ W) + bias  in the (N, B*F) layout.

    y_bf:    (N, batch*fin)  bf16  activation, batch folded into lanes
    w_bf:    (fin, fout)     bf16
    att_bf:  (N, N)          bf16
    bias:    (1, fout)       f32
    returns  (N, batch*fout) f32
    """
    # First matmul: per-batch lane slice @ W (tiny, padding-dominated on the
    # MXU), lane-concatenated back into the folded layout.  f32 accumulation.
    parts = [
        jnp.dot(y_bf[:, b * fin:(b + 1) * fin], w_bf,
                preferred_element_type=jnp.float32)
        for b in range(batch)
    ]
    support = jnp.concatenate(parts, axis=1).astype(jnp.bfloat16)    # (N, B*fout)
    # Second matmul: one wide 2-D dot, contraction over nodes (the dominant
    # FLOPs), with a lane-dense B*fout output.
    out = jnp.dot(att_bf, support, preferred_element_type=jnp.float32)
    bias_full = jnp.concatenate([bias_f32] * batch, axis=1)          # (1, B*fout)
    return out + bias_full


def _bn_tanh(y, gamma, beta, *, batch, fout, eps=BN_EPS):
    """Training-mode BatchNorm1d on the (B, N*F) view (== per-(n,f) statistics
    over the batch axis, biased variance), followed by tanh.

    y:      (N, batch*fout) f32
    gamma:  (N, fout)       f32
    beta:   (N, fout)       f32
    """
    groups = [y[:, b * fout:(b + 1) * fout] for b in range(batch)]   # B x (N,fout)
    mean = sum(groups) / batch
    var = sum((g - mean) * (g - mean) for g in groups) / batch       # biased var
    scale = gamma * jax.lax.rsqrt(var + eps)                         # (N, fout)
    shift = beta - mean * scale
    scale_full = jnp.concatenate([scale] * batch, axis=1)            # (N, B*fout)
    shift_full = jnp.concatenate([shift] * batch, axis=1)
    return jnp.tanh(y * scale_full + shift_full)


# ---------------------------------------------------------------------------
# Kernel 1: the spec module -- a single GraphConvolution layer
# ---------------------------------------------------------------------------
def _graph_conv_kernel(x_ref, w_ref, att_ref, b_ref, o_ref, *, batch, fin, fout):
    out = _gc_layer(x_ref[...], w_ref[...], att_ref[...], b_ref[...],
                    batch=batch, fin=fin, fout=fout)
    o_ref[...] = out.astype(o_ref.dtype)


def graph_conv(x, w, att, bias):
    """GraphConvolution.forward:  out = att @ (x @ w) + bias.

    x: (B, N, Fin) f32  ->  (B, N, Fout) f32.
    Grid-less pallas_call (single invocation, all operands VMEM-resident);
    operands are passed as bf16, accumulation is f32 in-kernel.
    """
    B, N, fin = x.shape
    fout = w.shape[1]
    # Fold batch into the lane dim: (B, N, Fin) -> (N, B*Fin).
    x2d = jnp.transpose(x, (1, 0, 2)).reshape(N, B * fin).astype(jnp.bfloat16)
    out2d = pl.pallas_call(
        functools.partial(_graph_conv_kernel, batch=B, fin=fin, fout=fout),
        out_shape=jax.ShapeDtypeStruct((N, B * fout), jnp.float32),
        in_specs=[pl.BlockSpec(memory_space=pltpu.MemorySpace.VMEM)] * 4,
        out_specs=pl.BlockSpec(memory_space=pltpu.MemorySpace.VMEM),
    )(x2d, w.astype(jnp.bfloat16), att.astype(jnp.bfloat16),
      bias.astype(jnp.float32).reshape(1, fout))
    return jnp.transpose(out2d.reshape(N, B, fout), (1, 0, 2))


# ---------------------------------------------------------------------------
# Kernel 2: the full GCN forward fused into a single pallas_call
# ---------------------------------------------------------------------------
def _make_gcn_kernel(batch, node_n, in_f, hid_f, num_stage, is_out_resi):
    del node_n  # shapes are carried by the refs

    def kernel(*refs):
        x_ref, o_ref = refs[0], refs[-1]
        it = iter(refs[1:-1])            # per-layer parameter refs, in order

        def gc(y_bf, fin, fout, with_bn):
            w = next(it)[...]
            att = next(it)[...]
            b = next(it)[...]
            out = _gc_layer(y_bf, w, att, b, batch=batch, fin=fin, fout=fout)
            if with_bn:
                g = next(it)[...]
                be = next(it)[...]
                out = _bn_tanh(out, g, be, batch=batch, fout=fout)
            return out                                    # (N, B*fout) f32

        x_bf = x_ref[...]                                 # (N, B*in_f) bf16
        y = gc(x_bf, in_f, hid_f, True)                   # gc1 + bn1 + tanh
        # dropout: identity (inference)
        for _ in range(num_stage):                        # GC_Block s
            blk_in = y                                    # f32, stays in VMEM
            y = gc(y.astype(jnp.bfloat16), hid_f, hid_f, True)
            y = gc(y.astype(jnp.bfloat16), hid_f, hid_f, True)
            y = y + blk_in                                # block residual
        out = gc(y.astype(jnp.bfloat16), hid_f, in_f, False)   # gc7 (no BN)
        if is_out_resi:
            out = out + x_bf.astype(jnp.float32)          # output residual
        o_ref[...] = out.astype(o_ref.dtype)

    return kernel


def gcn_forward(params, x, is_out_resi=True):
    """Full GCN forward (gc1+bn+tanh, num_stage residual blocks, gc7[+resi])
    as ONE fused pallas_call -- hidden activations never leave VMEM."""
    B, N, in_f = x.shape
    hid_f = params["gc1"]["w"].shape[1]
    num_stage = len(params["gcbs"])

    def gc_args(p):
        return [p["w"].astype(jnp.bfloat16),
                p["att"].astype(jnp.bfloat16),
                p["b"].astype(jnp.float32).reshape(1, -1)]

    def bn_args(p):
        return [p["gamma"].astype(jnp.float32).reshape(N, hid_f),
                p["beta"].astype(jnp.float32).reshape(N, hid_f)]

    inputs = [jnp.transpose(x, (1, 0, 2)).reshape(N, B * in_f).astype(jnp.bfloat16)]
    inputs += gc_args(params["gc1"]) + bn_args(params["bn1"])
    for blk in params["gcbs"]:
        inputs += gc_args(blk["gc1"]) + bn_args(blk["bn1"])
        inputs += gc_args(blk["gc2"]) + bn_args(blk["bn2"])
    inputs += gc_args(params["gc7"])

    out2d = pl.pallas_call(
        _make_gcn_kernel(B, N, in_f, hid_f, num_stage, is_out_resi),
        out_shape=jax.ShapeDtypeStruct((N, B * in_f), jnp.float32),
        in_specs=[pl.BlockSpec(memory_space=pltpu.MemorySpace.VMEM)] * len(inputs),
        out_specs=pl.BlockSpec(memory_space=pltpu.MemorySpace.VMEM),
    )(*inputs)
    return jnp.transpose(out2d.reshape(N, B, in_f), (1, 0, 2))


# ---------------------------------------------------------------------------
# Parameter init (mirrors GraphConvolution.reset_parameters / BN defaults)
# ---------------------------------------------------------------------------
def init_gc_params(key, in_features, out_features, node_n):
    stdv = 1.0 / math.sqrt(out_features)
    k1, k2, k3 = jax.random.split(key, 3)
    w = jax.random.uniform(k1, (in_features, out_features), jnp.float32, -stdv, stdv)
    att = jax.random.uniform(k2, (node_n, node_n), jnp.float32, -stdv, stdv)
    b = jax.random.uniform(k3, (out_features,), jnp.float32, -stdv, stdv)
    return {"w": w, "att": att, "b": b}


def init_bn_params(d):
    return {"gamma": jnp.ones((d,), jnp.float32), "beta": jnp.zeros((d,), jnp.float32)}


def init_gcn_params(key, input_feature, hidden_feature, num_stage, node_n):
    keys = jax.random.split(key, 2 + 2 * num_stage)
    params = {
        "gc1": init_gc_params(keys[0], input_feature, hidden_feature, node_n),
        "bn1": init_bn_params(node_n * hidden_feature),
        "gcbs": [],
        "gc7": init_gc_params(keys[1], hidden_feature, input_feature, node_n),
    }
    for i in range(num_stage):
        blk = {
            "gc1": init_gc_params(keys[2 + 2 * i], hidden_feature, hidden_feature, node_n),
            "bn1": init_bn_params(node_n * hidden_feature),
            "gc2": init_gc_params(keys[3 + 2 * i], hidden_feature, hidden_feature, node_n),
            "bn2": init_bn_params(node_n * hidden_feature),
        }
        params["gcbs"].append(blk)
    return params


# ---------------------------------------------------------------------------
if __name__ == "__main__":
    # Small, module-consistent shapes: batch=2, node_n=48, input_feature=16,
    # hidden_feature=32, num_stage=1.
    B, NODE_N, IN_F, HID_F, NUM_STAGE = 2, 48, 16, 32, 1

    key = jax.random.PRNGKey(0)
    k_params, k_x = jax.random.split(key)
    params = init_gcn_params(k_params, IN_F, HID_F, NUM_STAGE, NODE_N)
    x = jax.random.normal(k_x, (B, NODE_N, IN_F), jnp.float32)

    # 1) The spec module itself: a single GraphConvolution layer.
    gc1 = params["gc1"]
    out_layer = jax.block_until_ready(graph_conv(x, gc1["w"], gc1["att"], gc1["b"]))
    ref_layer = jnp.einsum("ij,bjf->bif", gc1["att"], x @ gc1["w"]) + gc1["b"]
    assert out_layer.shape == (B, NODE_N, HID_F), out_layer.shape
    max_err = float(jnp.max(jnp.abs(out_layer - ref_layer)))
    assert jnp.allclose(out_layer, ref_layer, rtol=3e-2, atol=3e-2), max_err

    # 2) Full GCN forward, fully fused into one pallas_call.
    fwd = jax.jit(functools.partial(gcn_forward, is_out_resi=True))
    out = jax.block_until_ready(fwd(params, x))
    assert out.shape == (B, NODE_N, IN_F), out.shape
    assert bool(jnp.all(jnp.isfinite(out)))
    print("KERNEL_OK")
</pallas_src>

<mosaic_0001>
module attributes {stable_mosaic.version = 11 : i64} {
  func.func @_graph_conv_kernel(%arg0: memref<48x32xbf16, #tpu.memory_space<vmem>>, %arg1: memref<16x32xbf16, #tpu.memory_space<vmem>>, %arg2: memref<48x48xbf16, #tpu.memory_space<vmem>>, %arg3: memref<1x32xf32, #tpu.memory_space<vmem>>, %arg4: memref<48x64xf32, #tpu.memory_space<vmem>>) attributes {dimension_semantics = [], scalar_prefetch = 0 : i64, scratch_operands = 0 : i64, tpu.core_type = #tpu.core_type<tc>} {
    %c0 = arith.constant 0 : index
    %c0_0 = arith.constant 0 : index
    %0 = vector.load %arg0[%c0, %c0_0] : memref<48x32xbf16, #tpu.memory_space<vmem>>, vector<48x32xbf16>
    %c0_1 = arith.constant 0 : index
    %c0_2 = arith.constant 0 : index
    %1 = vector.load %arg1[%c0_1, %c0_2] : memref<16x32xbf16, #tpu.memory_space<vmem>>, vector<16x32xbf16>
    %c0_3 = arith.constant 0 : index
    %c0_4 = arith.constant 0 : index
    %2 = vector.load %arg2[%c0_3, %c0_4] : memref<48x48xbf16, #tpu.memory_space<vmem>>, vector<48x48xbf16>
    %c0_5 = arith.constant 0 : index
    %c0_6 = arith.constant 0 : index
    %3 = vector.load %arg3[%c0_5, %c0_6] : memref<1x32xf32, #tpu.memory_space<vmem>>, vector<1x32xf32>
    %4 = vector.extract_strided_slice %0 {offsets = [0, 0], sizes = [48, 16], strides = [1, 1]} : vector<48x32xbf16> to vector<48x16xbf16>
    %cst = arith.constant dense<0.000000e+00> : vector<48x32xf32>
    %5 = tpu.matmul %4, %1, %cst {dimension_numbers = #tpu.dot_dimension_numbers<[1], [0], [0], [1], [0, 0, 1, 1], [], []>} : vector<48x16xbf16>, vector<16x32xbf16>, vector<48x32xf32> -> vector<48x32xf32>
    %6 = vector.extract_strided_slice %0 {offsets = [0, 16], sizes = [48, 16], strides = [1, 1]} : vector<48x32xbf16> to vector<48x16xbf16>
    %cst_7 = arith.constant dense<0.000000e+00> : vector<48x32xf32>
    %7 = tpu.matmul %6, %1, %cst_7 {dimension_numbers = #tpu.dot_dimension_numbers<[1], [0], [0], [1], [0, 0, 1, 1], [], []>} : vector<48x16xbf16>, vector<16x32xbf16>, vector<48x32xf32> -> vector<48x32xf32>
    %8 = tpu.concatenate %5, %7 in 1 : vector<48x32xf32>, vector<48x32xf32> -> vector<48x64xf32>
    %9 = arith.truncf %8 : vector<48x64xf32> to vector<48x64xbf16>
    %cst_8 = arith.constant dense<0.000000e+00> : vector<48x64xf32>
    %10 = tpu.matmul %2, %9, %cst_8 {dimension_numbers = #tpu.dot_dimension_numbers<[1], [0], [0], [1], [0, 0, 1, 1], [], []>} : vector<48x48xbf16>, vector<48x64xbf16>, vector<48x64xf32> -> vector<48x64xf32>
    %11 = tpu.concatenate %3, %3 in 1 : vector<1x32xf32>, vector<1x32xf32> -> vector<1x64xf32>
    %12 = vector.broadcast %11 : vector<1x64xf32> to vector<48x64xf32>
    %13 = arith.addf %10, %12 : vector<48x64xf32>
    %c0_9 = arith.constant 0 : index
    %c0_10 = arith.constant 0 : index
    %14 = vector.load %arg4[%c0_9, %c0_10] : memref<48x64xf32, #tpu.memory_space<vmem>>, vector<48x64xf32>
    tpu.vector_store %arg4[%c0_9, %c0_10], %13 {strides = array<i32>} : memref<48x64xf32, #tpu.memory_space<vmem>>, vector<48x64xf32>,
    return
  }
}

</mosaic_0001>

<bundles_post_ra>
// kernel: tpu_custom_call.1
= control target key start
LH: loop header
LB: loop body
LE: loop exit
PB: predicated region body
PF: predicated region fallthrough
CT: control target
= control target key end

     0   :  { %s475_s19 = smov 112   ;;  %v476_v3 = vmov 0.0   ;;  %vm477_vm0 = vmmov 0   ;;  %vm55_vm1 = vcmask 130048   ;;  %s577_s0 = inlined_call_operand.vmem [shape: bf16[48,32], index: 0, kind: input, shape index: {}]   ;;  %s578_s1 = inlined_call_operand.vmem [shape: bf16[16,32], index: 1, kind: input, shape index: {}]   ;;  %s579_s2 = inlined_call_operand.vmem [shape: bf16[48,48], index: 2, kind: input, shape index: {}]   ;;  %s580_s3 = inlined_call_operand.vmem [shape: f32[1,32], index: 3, kind: input, shape index: {}]   ;;  %s581_s4 = inlined_call_operand.hbm [shape: f32[48,64], index: 4, kind: output, shape index: {}]  }
   0x1   :  { %v446_v0 = vld [vmem:[%s577_s0] sm:$0xff]   ;;  %v447_v1 = vld [vmem:[%s577_s0 + $0x8] sm:$0xff]   ;;  %v448_v2 = vld [vmem:[%s577_s0 + $0x10] sm:$0xff]   ;;  %422 = vmatprep.subr.bf16.mxu1 %v476_v3  ;;  %386 = vmatprep.mubr.msk.bf16.mxu1 %vm477_vm0, %v476_v3 }
   0x2   :  { %122 = vrot.lane.b32.xlu0 %v446_v0, %s475_s19  ;;  %v449_v4 = vld [vmem:[%s578_s1] sm:$0xff]   ;;  %376 = vmatprep.subr.bf16.mxu0 %v476_v3 }
   0x3   :  { %126 = vrot.lane.b32.xlu1 %v448_v2, %s475_s19  ;;  %378 = vmatprep.mubr.msk.bf16.mxu0 %vm477_vm0, %v476_v3 }
   0x4   :  { %423 = vmatpush3.bf16.msra.mxu1 %v449_v4  ;;  %377 = vmatpush3.bf16.msra.mxu0 %v449_v4 }
   0x5   :  { %390 = vmatprep.subr.bf16.mxu1 %v476_v3 }
   0x6   :  { %124 = vrot.lane.b32.xlu0 %v447_v1, %s475_s19 }
   0x7   :  { %9 = vsyncpa [#allocation3], 0  ;;  %404 = vmatprep.subr.bf16.mxu0 %v476_v3  ;;  %387 = vmatmul.mubr.msk.bf16.vlgmr.msra.gmra.mxu1 %vm55_vm1, %v448_v2  ;;  %s478_s0 = smov 32   ;;  %v229_v35 = vlaneseq  ;;  %v33_v37 = vld [vmem:[%s580_s3] sm:$0x1]  ;;  %vm218_vm2 = vcmask 261120  }
   0x8   :  { %379 = vmatmul.mubr.msk.bf16.vlgmr.msra.gmra.mxu0 %vm55_vm1, %v446_v0  ;;  %391 = vmatpush3.bf16.msra.mxu1 %v449_v4  ;;  %v450_v58 = vld [vmem:[%s579_s2] sm:$0xff]   ;;  %vm256_vm3 = vcmask 392192   ;;  %v451_v59 = vld [vmem:[%s579_s2 + $0x8] sm:$0xff]   ;;  %v452_v60 = vld [vmem:[%s579_s2 + $0x10] sm:$0xff]   ;;  %vm323_vm4 = vcmask 523264   ;;  %s479_s2 = smov [#allocation2]  }
   0x9   :  { %392 = vmatprep.mubr.msk.bf16.mxu1 %vm477_vm0, %v476_v3  ;;  %382 = vmatprep.mubr.msk.bf16.mxu0 %vm477_vm0, %v476_v3  ;;  %v230_v36 = vshrl.u32 %v229_v35, 7  ;;  %s335_s30 = sshll.u32 %s479_s2, 4  ;;  %s336_s30 = int_to_ptr.vmem [resolvable:$true] %s335_s30 }
   0xa   :  { %s453_s5 = scalar_lea.vmem %s336_s30, 768  ;;  %p458_p1 = scmp.lt.s32.totalorder %s336_s30, %s336_s30 }
   0xb   :  { %v231_v38 = vsub.s32 0, %v230_v36  ;;  %p454_p0 = scmp.ne.s32.totalorder %s336_s30, %s453_s5  ;;  %p459_p2 = scmp.lt.s32.totalorder %s453_s5, %s453_s5 }
   0xd   :  { %v232_v39 = vrot.slane %v33_v37, %v231_v38  ;;  %p460_p3 = por %p459_p2, %p458_p1 }
   0xf   :  { %p461_p4 = pnand %p460_p3, %p454_p0 }
  0x10   :  { %383 = vmatmul.mubr.msk.bf16.gmra.mxu0 %vm55_vm1, %v447_v1 }
  0x11   :  { %410 = vmatprep.mubr.msk.bf16.mxu0 %vm477_vm0, %v476_v3 }
  0x74   :  { %v123_v5 = vpop.permute.xlu0 %122 }
  0x75   :  { %393 = vmatmul.mubr.msk.bf16.vlgmr.msra.gmra.mxu1 %vm55_vm1, %v123_v5  ;;  %v127_v7 = vpop.permute.xlu1 %126 }
  0x76   :  { %396 = vmatprep.mubr.msk.bf16.mxu1 %vm477_vm0, %v476_v3 }
  0x78   :  { %v125_v6 = vpop.permute.xlu0 %124 }
  0x7d   :  { %397 = vmatmul.mubr.msk.bf16.gmra.mxu1 %vm55_vm1, %v125_v6 }
  0x7e   :  { %400 = vmatprep.mubr.msk.bf16.mxu1 %vm477_vm0, %v476_v3 }
  0x85   :  { %401 = vmatmul.mubr.msk.bf16.gmra.mxu1 %vm55_vm1, %v127_v7 }
  0xc7   :  { %v115_v8 = vpop.f32.mrf.mxu1 }
  0xc8   :  { %v99_v12 = vpop.f32.mrf.mxu0 }
  0xc9   :  { %v388_v9 = vpop.f32.mrf.mxu1 }
  0xca   :  { %v380_v13 = vpop.f32.mrf.mxu0 }
  0xcb   :  { %v118_v10 = vpop.f32.mrf.mxu1 }
  0xcc   :  { %v102_v14 = vpop.f32.mrf.mxu0 }
  0xcd   :  { %v389_v11 = vpop.f32.mrf.mxu1 }
  0xce   :  { %v381_v15 = vpop.f32.mrf.mxu0 }
  0xd0   :  { %v107_v16 = vpop.f32.mrf.mxu0 }
  0xd2   :  { %v384_v17 = vpop.f32.mrf.mxu0 }
  0xd4   :  { %v110_v20 = vpop.f32.mrf.mxu0 }
  0xd6   :  { %v385_v22 = vpop.f32.mrf.mxu0 }
 0x135   :  { %v171_v18 = vpop.f32.mrf.mxu1 }
 0x137   :  { %v394_v19 = vpop.f32.mrf.mxu1 }
 0x139   :  { %v174_v21 = vpop.f32.mrf.mxu1 }
 0x13a   :  { %v441_v34 = vpack.i.bf16 %v174_v21, %v171_v18 }
 0x13b   :  { %v395_v23 = vpop.f32.mrf.mxu1 }
 0x13d   :  { %v179_v24 = vpop.f32.mrf.mxu1 }
 0x13f   :  { %v398_v25 = vpop.f32.mrf.mxu1 }
 0x141   :  { %v182_v26 = vpop.f32.mrf.mxu1 }
 0x142   :  { %v436_v27 = vpack.i.bf16 %v182_v26, %v179_v24 }
 0x143   :  { %v399_v28 = vpop.f32.mrf.mxu1 }
 0x144   :  { %437 = vrot.lane.b32.xlu0 %v436_v27, %s478_s0 }
 0x145   :  { %v187_v29 = vpop.f32.mrf.mxu1 }
 0x147   :  { %v402_v30 = vpop.f32.mrf.mxu1 }
 0x148   :  { %233 = vrot.lane.b32.xlu0 %v232_v39, %s478_s0 }
 0x149   :  { %v190_v31 = vpop.f32.mrf.mxu1 }
 0x14a   :  { %v431_v32 = vpack.i.bf16 %v190_v31, %v187_v29 }
 0x14b   :  { %v403_v33 = vpop.f32.mrf.mxu1 }
 0x14c   :  { %432 = vrot.lane.b32.xlu1 %v431_v32, %s478_s0 }
 0x150   :  { %442 = vrot.lane.b32.xlu1 %v441_v34, %s478_s0 }
 0x1b6   :  { %v438_v40 = vpop.permute.xlu0 %437 }
 0x1b7   :  { %v440_v42 = vunpack.i.h.bf16 %v438_v40  ;;  %v439_v43 = vunpack.i.l.bf16 %v438_v40 }
 0x1b9   :  { %v221_v50 = vsel %vm218_vm2, %v107_v16, %v439_v43  ;;  %v222_v51 = vsel %vm218_vm2, %v110_v20, %v440_v42 }
 0x1ba   :  { %v226_v54 = vpack.c.bf16 %v222_v51, %v221_v50  ;;  %v234_v61 = vpop.permute.xlu0 %233 }
 0x1bb   :  { %v236_v62 = vsel %vm218_vm2, %v33_v37, %v234_v61 }
 0x1bc   :  { %v240_v63 = vrot.slane %v236_v62, %v231_v38 }
 0x1be   :  { %v433_v41 = vpop.permute.xlu1 %432 }
 0x1bf   :  { %v435_v44 = vunpack.i.h.bf16 %v433_v41  ;;  %v434_v45 = vunpack.i.l.bf16 %v433_v41 }
 0x1c1   :  { %v224_v46 = vsel %vm218_vm2, %v118_v10, %v435_v44  ;;  %v223_v47 = vsel %vm218_vm2, %v115_v8, %v434_v45 }
 0x1c2   :  { %v227_v48 = vpack.c.bf16 %v224_v46, %v223_v47  ;;  %v443_v49 = vpop.permute.xlu1 %442 }
 0x1c3   :  { %v445_v52 = vunpack.i.h.bf16 %v443_v49  ;;  %v444_v53 = vunpack.i.l.bf16 %v443_v49 }
 0x1c4   :  { %405 = vmatpush3.bf16.msra.mxu0 %v227_v48 }
 0x1c5   :  { %406 = vmatprep.subr.bf16.mxu0 %v476_v3  ;;  %v219_v55 = vsel %vm218_vm2, %v99_v12, %v444_v53  ;;  %v220_v56 = vsel %vm218_vm2, %v102_v14, %v445_v52 }
 0x1c6   :  { %v225_v57 = vpack.c.bf16 %v220_v56, %v219_v55 }
 0x1c8   :  { %407 = vmatpush3.bf16.msra.mxu0 %v226_v54 }
 0x1c9   :  { %408 = vmatprep.subr.bf16.mxu0 %v476_v3 }
 0x1cc   :  { %409 = vmatpush3.bf16.msra.mxu0 %v225_v57 }
 0x1cf   :  { %411 = vmatmul.mubr.msk.bf16.vlgmr.msra.gmra.mxu0 %vm256_vm3, %v450_v58 }
 0x1d0   :  { %414 = vmatprep.mubr.msk.bf16.mxu0 %vm477_vm0, %v476_v3 }
 0x1d7   :  { %415 = vmatmul.mubr.msk.bf16.gmra.mxu0 %vm256_vm3, %v451_v59 }
 0x1d8   :  { %418 = vmatprep.mubr.msk.bf16.mxu0 %vm477_vm0, %v476_v3 }
 0x1df   :  { %419 = vmatmul.mubr.msk.bf16.gmra.mxu0 %vm256_vm3, %v452_v60 }
 0x28f   :  { %v300_v0 = vpop.f32.mrf.mxu0 }
 0x290   :  { %v301_v1 = vadd.f32 %v300_v0, %v240_v63 }
 0x291   :  { %v412_v2 = vpop.f32.mrf.mxu0 }
 0x292   :  { %324 = vst.msk [vmem:[#allocation2] sm:$0xff] %vm323_vm4, %v301_v1 }
 0x293   :  { %v303_v4 = vpop.f32.mrf.mxu0 }
 0x294   :  { %v304_v5 = vadd.f32 %v303_v4, %v240_v63 }
 0x295   :  { %v413_v6 = vpop.f32.mrf.mxu0 }
 0x296   :  { %325 = vst.msk [vmem:[#allocation2 + $0x8] sm:$0xff] %vm323_vm4, %v304_v5 }
 0x297   :  { %v308_v3 = vpop.f32.mrf.mxu0 }
 0x298   :  { %v309_v7 = vadd.f32 %v308_v3, %v240_v63 }
 0x299   :  { %v416_v8 = vpop.f32.mrf.mxu0 }
 0x29a   :  { %326 = vst.msk [vmem:[#allocation2 + $0x10] sm:$0xff] %vm323_vm4, %v309_v7 }
 0x29b   :  { %v311_v9 = vpop.f32.mrf.mxu0 }
 0x29c   :  { %v312_v10 = vadd.f32 %v311_v9, %v240_v63 }
 0x29d   :  { %v417_v11 = vpop.f32.mrf.mxu0 }
 0x29e   :  { %327 = vst.msk [vmem:[#allocation2 + $0x18] sm:$0xff] %vm323_vm4, %v312_v10 }
 0x29f   :  { %v316_v12 = vpop.f32.mrf.mxu0 }
 0x2a0   :  { %v317_v13 = vadd.f32 %v316_v12, %v240_v63 }
 0x2a1   :  { %v420_v14 = vpop.f32.mrf.mxu0 }
 0x2a2   :  { %328 = vst.msk [vmem:[#allocation2 + $0x20] sm:$0xff] %vm323_vm4, %v317_v13 }
 0x2a3   :  { %v319_v15 = vpop.f32.mrf.mxu0 }
 0x2a4   :  { %v320_v16 = vadd.f32 %v319_v15, %v240_v63 }
 0x2a5   :  { %v421_v17 = vpop.f32.mrf.mxu0 }
 0x2a6   :  { %329 = vst.msk [vmem:[#allocation2 + $0x28] sm:$0xff] %vm323_vm4, %v320_v16 }
 0x2a7   :  { %464 = shalt.err (!%p461_p4)
}
 0x2a8   :  { %s480_s6 = smov 128   ;;  %s481_s7 = smov 8  }
 0x2a9   :  { %341 = dma.vmem_to_hbm [thread:$0]  %s336_s30, 768, %s581_s4, [#allocation3], %s480_s6, %s480_s6, %s481_s7  }
 0x2aa   :  { %473 = dma.done.wait [#allocation3], 768  }
 0x2ab   :  { %474 = vsyncadd [#allocation3], 4294966528 }
 0x2ac   :  { %345 = vsyncpa [#allocation3], 1 }

</bundles_post_ra>
